<compile_context>
chip_gen: v7x
topology: tpu7x:2x2x1
jax: 0.10.0
libtpu: 0.0.40
codegen_flags: <defaults>
</compile_context>

<pallas_src>
import functools

import numpy as np
import jax
import jax.numpy as jnp
from jax import lax
from jax.experimental import pallas as pl
from jax.experimental.pallas import tpu as pltpu


# ---------------------------------------------------------------------------
# Pallas kernel.  One grid step handles all NS input views x a lane-dense tile
# of C = (scene, target-view) columns.
#   inp_ref : (16, NS, C)  pose-entry-major input poses, pre-expanded over
#                          target views (column c = scene*NT + target)
#   tgt_ref : (16, C)      pose-entry-major target poses
#   out_ref : (NS, C)      normalized weights (sum over the NS axis == 1)
# ---------------------------------------------------------------------------
def _cam_weight_kernel(inp_ref, tgt_ref, out_ref, *, method, param):
    ns, cols = out_ref.shape

    def cin(k):                       # (NS, C) — full tile load, no broadcast
        return inp_ref[k]

    def ctg(k):                       # (1, C) — broadcasts over sublanes at use
        return tgt_ref[k:k + 1, :]

    def ctg_full(k):                  # hoisted (NS, C) sublane broadcast
        return jnp.broadcast_to(tgt_ref[k:k + 1, :], (ns, cols))

    if method in ("distance", "distance_squared", "distance_cubed",
                  "distance_gaussian"):
        d2 = None                     # translation entries: flat indices 3, 7, 11
        for k in (3, 7, 11):
            diff = cin(k) - ctg(k)
            sq = diff * diff
            d2 = sq if d2 is None else d2 + sq
        if method == "distance_gaussian":
            raw = jnp.exp(-param * d2)
        else:
            # Single EUP rsqrt instead of sqrt + divide; the 1e-12 guard equals
            # 1/(d + 1e-6) exactly at d == 0 and differs by ~1e-6 rel elsewhere.
            r = lax.rsqrt(d2 + 1e-12)
            if method == "distance":
                raw = r
            elif method == "distance_squared":
                raw = r * r
            else:                     # distance_cubed
                raw = r * r * r
    elif method == "l1":
        s = None
        for k in range(12):           # bottom row [0,0,0,1] diff is exactly 0
            term = jnp.abs(cin(k) - ctg(k))
            s = term if s is None else s + term
        raw = 1.0 / (s + 1e-6)
    elif method == "f_norm":
        s = None
        for k in range(12):           # bottom row diff is exactly 0
            d = cin(k) - ctg(k)
            s = d * d if s is None else s + d * d
        raw = lax.rsqrt(s + 1e-12)    # == 1/(sqrt(s) + 1e-6) to ~1e-6 rel.
    elif method == "rel_cam_pose_norm":
        # rel_R = R_in @ R_tgt^T ; rel_t = t_in - rel_R @ t_tgt ; rel[3,3] = 1
        # weight = 1 / ||rel||_F, fully unrolled as elementwise ops on (NS, C).
        # Target-entry broadcasts are hoisted once (each reused 3x); only one
        # rel_R row is kept live at a time to bound vreg pressure.
        tgR = [[ctg_full(4 * b + c) for c in range(3)] for b in range(3)]
        tgT = [ctg_full(4 * b + 3) for b in range(3)]
        norm2 = None
        for a in range(3):
            in_row = [cin(4 * a + c) for c in range(3)]
            rel_row = []
            for b in range(3):
                r = (in_row[0] * tgR[b][0] + in_row[1] * tgR[b][1]
                     + in_row[2] * tgR[b][2])
                rel_row.append(r)
                norm2 = r * r if norm2 is None else norm2 + r * r
            rel_t = (cin(4 * a + 3) - rel_row[0] * tgT[0]
                     - rel_row[1] * tgT[1] - rel_row[2] * tgT[2])
            norm2 = norm2 + rel_t * rel_t
        norm2 = norm2 + 1.0           # fixed bottom-right 1 of the rel pose
        raw = lax.rsqrt(norm2)        # norm2 >= 1 -> safe; matches 1/(n + 1e-6)
    else:
        raise NotImplementedError(method)

    # Normalize over input views (sublane axis).  Reciprocal on the small
    # (1, C) denominator then a broadcast multiply: NS x fewer EUP ops than a
    # full-tile divide.  (No eps, matching the PyTorch reference behaviour.)
    denom = jnp.sum(raw, axis=0, keepdims=True)
    out_ref[...] = raw * pl.reciprocal(denom, approx=False)


# ---------------------------------------------------------------------------
# Column-tile chooser: lane-dense (multiple of 128 or full extent), budgeted
# from VMEM, and >= 2 grid steps for big problems so both v7x TCs get work.
# ---------------------------------------------------------------------------
def _choose_col_tile(total_cols, num_views):
    if total_cols <= 256:
        return total_cols             # single full-extent block
    # f32 bytes per column, double-buffered by the BlockSpec pipeline.
    per_col = (16 * num_views + 16 + num_views) * 4 * 2
    budget = 8 << 20                  # safely under every chip's scoped-VMEM default
    vmem_tile = max(128, (budget // per_col) // 128 * 128)
    two_step_tile = pl.cdiv(pl.cdiv(total_cols, 2), 128) * 128
    return int(min(vmem_tile, two_step_tile))


# ---------------------------------------------------------------------------
# Plain-JAX fallback for the acos-based method.
# ---------------------------------------------------------------------------
def _error_weighting_jax(input_poses, target_poses, alpha):
    # TODO(synk): torch.acos has no clean Pallas/Mosaic lowering; this method
    # runs in plain JAX.
    ip = jnp.asarray(input_poses, jnp.float32)
    tp = jnp.asarray(target_poses, jnp.float32)
    r_in, t_in = ip[:, :, :3, :3], ip[:, :, :3, 3]
    r_tg, t_tg = tp[:, :, :3, :3], tp[:, :, :3, 3]
    r_ti = jnp.einsum("stab,siac->sitbc", r_tg, r_in)          # R_tgt^T @ R_in
    trace = r_ti[..., 0, 0] + r_ti[..., 1, 1] + r_ti[..., 2, 2]
    rot_err = jnp.arccos((trace - 1.0) / 2.0) / 3.1415926535
    d = jnp.sqrt(((t_tg[:, None, :, :] - t_in[:, :, None, :]) ** 2).sum(-1))
    trans_err = d / jnp.max(d, axis=1, keepdims=True)
    total = alpha * rot_err + (1.0 - alpha) * trans_err
    w = jnp.nan_to_num(1.0 / (total + 1e-6))
    return w / jnp.sum(w, axis=1, keepdims=True)


# ---------------------------------------------------------------------------
# Wrapper: mirrors DeterministicCamWeighter.forward(input_poses, target_poses)
#   input_poses : (S, NS, 4, 4), target_poses : (S, NT, 4, 4)
#   returns weights (S, NS, NT) that sum to 1 over the NS axis.
# ---------------------------------------------------------------------------
def deterministic_cam_weighter(method_name, input_poses, target_poses, *,
                               col_tile=None):
    S, NS = input_poses.shape[:2]
    NT = target_poses.shape[1]

    # ---- trace-time method dispatch (mirrors the PyTorch string dispatch) --
    if method_name == "baseline_mean" or NS < 2:
        # Constant fill: skip the kernel (no pose DMA, no grid overhead).
        return jnp.full((S, NS, NT), 1.0 / NS, jnp.float32)
    if method_name.startswith("error_weighing_alpha="):
        return _error_weighting_jax(input_poses, target_poses,
                                    float(method_name.split("=")[-1]))

    param = 0.0
    if method_name == "distance":
        method = "distance"
    elif method_name == "distance_squared":
        method = "distance_squared"
    elif method_name == "distance_cubed":
        method = "distance_cubed"
    elif method_name.startswith("distance_gaussian_b="):
        method, param = "distance_gaussian", float(method_name.split("=")[-1])
    elif method_name == "l1_weighing":
        method = "l1"
    elif method_name == "f_norm_weighting":
        method = "f_norm"
    elif method_name in ("rel_cam_poses_l2", "rel_cam_poses_f_norm"):
        method = "rel_cam_pose_norm"                # identical Frobenius norm
    else:
        raise AssertionError(f"{method_name} cam weighting algo not implemented")

    # ---- lane-dense repack (tiny host-side plumbing, done once per call) ---
    C = S * NT
    inp16 = jnp.asarray(input_poses, jnp.float32).reshape(S, NS, 16)
    inp_k = jnp.transpose(inp16, (2, 1, 0))                       # (16, NS, S)
    inp_k = jnp.broadcast_to(inp_k[:, :, :, None],
                             (16, NS, S, NT)).reshape(16, NS, C)  # expand over targets
    tgt16 = jnp.asarray(target_poses, jnp.float32).reshape(S, NT, 16)
    tgt_k = jnp.transpose(tgt16, (2, 0, 1)).reshape(16, C)        # (16, S*NT)

    if col_tile is None:
        col_tile = _choose_col_tile(C, NS)
    grid = (pl.cdiv(C, col_tile),)

    kernel = functools.partial(_cam_weight_kernel, method=method, param=param)
    out2d = pl.pallas_call(
        kernel,
        out_shape=jax.ShapeDtypeStruct((NS, C), jnp.float32),
        grid=grid,
        in_specs=[pl.BlockSpec((16, NS, col_tile), lambda b: (0, 0, b)),
                  pl.BlockSpec((16, col_tile), lambda b: (0, b))],
        out_specs=pl.BlockSpec((NS, col_tile), lambda b: (0, b)),
        compiler_params=pltpu.CompilerParams(
            dimension_semantics=("parallel",)),
    )(inp_k, tgt_k)

    # (NS, S*NT) -> (S, NS, NT)
    return jnp.transpose(out2d.reshape(NS, S, NT), (1, 0, 2))


# ---------------------------------------------------------------------------
# NumPy reference mirroring the PyTorch per-(scene, target) loops exactly.
# ---------------------------------------------------------------------------
def _reference(method_name, input_poses, target_poses):
    ip = np.asarray(input_poses, np.float64)
    tp = np.asarray(target_poses, np.float64)
    S, NS = ip.shape[:2]
    NT = tp.shape[1]
    out = np.zeros((S, NS, NT), np.float64)
    for s in range(S):
        for j in range(NT):
            P, q = ip[s], tp[s, j]
            if method_name == "baseline_mean" or NS < 2:
                w = np.full((NS,), 1.0 / NS)
            elif method_name in ("distance", "distance_squared",
                                 "distance_cubed") or \
                    method_name.startswith("distance_gaussian_b="):
                d = np.sqrt(((q[:3, 3][None] - P[:, :3, 3]) ** 2).sum(-1))
                if method_name == "distance":
                    w = 1.0 / (d + 1e-6)
                elif method_name == "distance_squared":
                    w = 1.0 / (d ** 2 + 1e-6)
                elif method_name == "distance_cubed":
                    w = 1.0 / (d ** 3 + 1e-6)
                else:
                    b = float(method_name.split("=")[-1])
                    w = np.exp(-b * d ** 2)
                w = w / w.sum()
            elif method_name == "l1_weighing":
                diffs = np.abs(q[None] - P).sum(-1).sum(-1)
                w = 1.0 / (diffs + 1e-6)
                w = w / w.sum()
            elif method_name == "f_norm_weighting":
                diffs = np.sqrt(((q[None] - P) ** 2).sum(-1).sum(-1))
                w = 1.0 / (diffs + 1e-6)
                w = w / w.sum()
            elif method_name in ("rel_cam_poses_l2", "rel_cam_poses_f_norm"):
                rel = np.zeros((NS, 4, 4))
                rel[:, :3, :3] = P[:, :3, :3] @ q[:3, :3].T[None]
                rel[:, :3, 3:] = -rel[:, :3, :3] @ q[:3, 3:] + P[:, :3, 3:]
                rel[:, 3, 3] = 1.0
                n = np.sqrt((rel ** 2).sum(axis=(-1, -2)))
                w = 1.0 / (n + 1e-6)
                w = w / w.sum()
            else:
                raise AssertionError(method_name)
            out[s, :, j] = w
    return out


if __name__ == "__main__":
    key = jax.random.PRNGKey(0)
    ksrc, ktgt = jax.random.split(key)
    S, NS, NT = 2, 8, 4   # num_scenes, num_input_views, num_target_views

    def make_poses(k, n):
        kr, kt = jax.random.split(k)
        m = jax.random.normal(kr, (n, 3, 3), jnp.float32)
        rot, _ = jnp.linalg.qr(m)                       # rotation-like 3x3
        t = jax.random.normal(kt, (n, 3, 1), jnp.float32)
        top = jnp.concatenate([rot, t], axis=-1)
        bottom = jnp.tile(jnp.array([[[0., 0., 0., 1.]]], jnp.float32),
                          (n, 1, 1))
        return jnp.concatenate([top, bottom], axis=-2)

    input_poses = make_poses(ksrc, S * NS).reshape(S, NS, 4, 4)
    target_poses = make_poses(ktgt, S * NT).reshape(S, NT, 4, 4)

    methods = [
        "baseline_mean", "distance", "distance_squared", "distance_cubed",
        "distance_gaussian_b=1.0", "l1_weighing", "f_norm_weighting",
        "rel_cam_poses_l2", "rel_cam_poses_f_norm",
    ]

    for m in methods:
        out = deterministic_cam_weighter(m, input_poses, target_poses)
        out = jax.block_until_ready(out)
        assert out.shape == (S, NS, NT), (m, out.shape)
        ref = _reference(m, input_poses, target_poses)
        np.testing.assert_allclose(np.asarray(out), ref, rtol=1e-3, atol=1e-4,
                                   err_msg=f"method={m}")
        # weights must sum to 1 over input views
        np.testing.assert_allclose(np.asarray(out).sum(axis=1),
                                   np.ones((S, NT)), rtol=1e-4, atol=1e-4,
                                   err_msg=f"method={m} (normalization)")

    print("KERNEL_OK")
</pallas_src>

<mosaic_0001>
module attributes {stable_mosaic.version = 11 : i64} {
  func.func @_cam_weight_kernel(%arg0: i32, %arg1: memref<16x8x8xf32, #tpu.memory_space<vmem>>, %arg2: memref<16x8xf32, #tpu.memory_space<vmem>>, %arg3: memref<8x8xf32, #tpu.memory_space<vmem>>) attributes {dimension_semantics = [#tpu.dimension_semantics<parallel>], iteration_bounds = array<i64: 1>, scalar_prefetch = 0 : i64, scratch_operands = 0 : i64, tpu.core_type = #tpu.core_type<tc>, window_params = [{transform_indices = @transform_0, window_bounds = array<i64: 16, 8, 8>}, {transform_indices = @transform_1, window_bounds = array<i64: 16, 8>}, {transform_indices = @transform_2, window_bounds = array<i64: 8, 8>}]} {
    %c3 = arith.constant 3 : index
    %c0 = arith.constant 0 : index
    %c0_0 = arith.constant 0 : index
    %0 = vector.load %arg1[%c3, %c0, %c0_0] : memref<16x8x8xf32, #tpu.memory_space<vmem>>, vector<1x8x8xf32>
    %1 = vector.shape_cast %0 : vector<1x8x8xf32> to vector<8x8xf32>
    %c3_1 = arith.constant 3 : index
    %c0_2 = arith.constant 0 : index
    %2 = vector.load %arg2[%c3_1, %c0_2] : memref<16x8xf32, #tpu.memory_space<vmem>>, vector<1x8xf32>
    %3 = vector.broadcast %2 : vector<1x8xf32> to vector<8x8xf32>
    %4 = arith.subf %1, %3 : vector<8x8xf32>
    %5 = arith.mulf %4, %4 : vector<8x8xf32>
    %c7 = arith.constant 7 : index
    %c0_3 = arith.constant 0 : index
    %c0_4 = arith.constant 0 : index
    %6 = vector.load %arg1[%c7, %c0_3, %c0_4] : memref<16x8x8xf32, #tpu.memory_space<vmem>>, vector<1x8x8xf32>
    %7 = vector.shape_cast %6 : vector<1x8x8xf32> to vector<8x8xf32>
    %c7_5 = arith.constant 7 : index
    %c0_6 = arith.constant 0 : index
    %8 = vector.load %arg2[%c7_5, %c0_6] : memref<16x8xf32, #tpu.memory_space<vmem>>, vector<1x8xf32>
    %9 = vector.broadcast %8 : vector<1x8xf32> to vector<8x8xf32>
    %10 = arith.subf %7, %9 : vector<8x8xf32>
    %11 = arith.mulf %10, %10 : vector<8x8xf32>
    %12 = arith.addf %5, %11 : vector<8x8xf32>
    %c11 = arith.constant 11 : index
    %c0_7 = arith.constant 0 : index
    %c0_8 = arith.constant 0 : index
    %13 = vector.load %arg1[%c11, %c0_7, %c0_8] : memref<16x8x8xf32, #tpu.memory_space<vmem>>, vector<1x8x8xf32>
    %14 = vector.shape_cast %13 : vector<1x8x8xf32> to vector<8x8xf32>
    %c11_9 = arith.constant 11 : index
    %c0_10 = arith.constant 0 : index
    %15 = vector.load %arg2[%c11_9, %c0_10] : memref<16x8xf32, #tpu.memory_space<vmem>>, vector<1x8xf32>
    %16 = vector.broadcast %15 : vector<1x8xf32> to vector<8x8xf32>
    %17 = arith.subf %14, %16 : vector<8x8xf32>
    %18 = arith.mulf %17, %17 : vector<8x8xf32>
    %19 = arith.addf %12, %18 : vector<8x8xf32>
    %cst = arith.constant 9.99999996E-13 : f32
    %20 = vector.broadcast %cst : f32 to vector<8x8xf32>
    %21 = arith.addf %19, %20 : vector<8x8xf32>
    %22 = math.rsqrt %21 : vector<8x8xf32>
    %cst_11 = arith.constant dense<0.000000e+00> : vector<8xf32>
    %23 = vector.multi_reduction <add>, %22, %cst_11 [0] : vector<8x8xf32> to vector<8xf32>
    %24 = vector.shape_cast %23 : vector<8xf32> to vector<1x8xf32>
    %25 = tpu.reciprocal %24 : vector<1x8xf32> -> vector<1x8xf32>
    %26 = vector.broadcast %25 : vector<1x8xf32> to vector<8x8xf32>
    %27 = arith.mulf %22, %26 : vector<8x8xf32>
    %c0_12 = arith.constant 0 : index
    %c0_13 = arith.constant 0 : index
    %28 = vector.load %arg3[%c0_12, %c0_13] : memref<8x8xf32, #tpu.memory_space<vmem>>, vector<8x8xf32>
    tpu.vector_store %arg3[%c0_12, %c0_13], %27 {strides = array<i32>} : memref<8x8xf32, #tpu.memory_space<vmem>>, vector<8x8xf32>,
    return
  }
  func.func @transform_0(%arg0: i32) -> (i32, i32, i32) {
    %c0_i32 = arith.constant 0 : i32
    %c0_i32_0 = arith.constant 0 : i32
    %c0_i32_1 = arith.constant 0 : i32
    return %c0_i32, %c0_i32_0, %arg0 : i32, i32, i32
  }
  func.func @transform_1(%arg0: i32) -> (i32, i32) {
    %c0_i32 = arith.constant 0 : i32
    %c0_i32_0 = arith.constant 0 : i32
    return %c0_i32, %arg0 : i32, i32
  }
  func.func @transform_2(%arg0: i32) -> (i32, i32) {
    %c0_i32 = arith.constant 0 : i32
    %c0_i32_0 = arith.constant 0 : i32
    return %c0_i32, %arg0 : i32, i32
  }
}

</mosaic_0001>

<bundles_post_ra>
// kernel: tpu_custom_call.1
= control target key start
LH: loop header
LB: loop body
LE: loop exit
PB: predicated region body
PF: predicated region fallthrough
CT: control target
= control target key end

     0   :  { %s149_s0 = inlined_call_operand.vmem [shape: f32[16,8,8], index: 0, kind: input, shape index: {}]   ;;  %s150_s1 = inlined_call_operand.vmem [shape: f32[16,8], index: 1, kind: input, shape index: {}]   ;;  %s151_s2 = inlined_call_operand.hbm [shape: f32[8,8], index: 2, kind: output, shape index: {}]  }
   0x1   :  { %v68_v0 = vld [vmem:[%s149_s0 + $0x18] sm:$0xff]  ;;  %v69_v1 = vld [vmem:[%s150_s1 + $0x3] ss:$0 sm:$0xff]  ;;  %v71_v4 = vld [vmem:[%s150_s1 + $0x7] ss:$0 sm:$0xff] }
   0x2   :  { %v70_v2 = vld [vmem:[%s149_s0 + $0x38] sm:$0xff]  ;;  %v19_v3 = vsub.f32 %v68_v0, %v69_v1  ;;  %v73_v6 = vld [vmem:[%s150_s1 + $0xb] ss:$0 sm:$0xff] }
   0x3   :  { %v72_v5 = vld [vmem:[%s149_s0 + $0x58] sm:$0xff]  ;;  %v28_v7 = vsub.f32 %v70_v2, %v71_v4 }
   0x4   :  { %v38_v8 = vsub.f32 %v72_v5, %v73_v6 }
   0x5   :  { %7 = vsyncpa [#allocation3], 0  ;;  %v20_v9 = vmul.f32 %v19_v3, %v19_v3  ;;  %v29_v10 = vmul.f32 %v28_v7, %v28_v7  ;;  %vm43_vm0 = vcmask 64512   ;;  %s103_s0 = smov [#allocation2]  }
   0x6   :  { %v39_v11 = vmul.f32 %v38_v8, %v38_v8  ;;  %s60_s1 = sshll.u32 %s103_s0, 4  ;;  %s61_s1 = int_to_ptr.vmem [resolvable:$true] %s60_s1 }
   0x7   :  { %v30_v12 = vadd.f32 %v29_v10, %v20_v9  ;;  %s79_s21 = scalar_lea.vmem %s61_s1, 128  ;;  %p84_p1 = scmp.lt.s32.totalorder %s61_s1, %s61_s1 }
   0x8   :  { %p80_p0 = scmp.ne.s32.totalorder %s61_s1, %s79_s21  ;;  %p85_p2 = scmp.lt.s32.totalorder %s79_s21, %s79_s21 }
   0x9   :  { %v40_v13 = vadd.f32 %v39_v11, %v30_v12 }
   0xa   :  { %p86_p3 = por %p85_p2, %p84_p1 }
   0xb   :  { %v41_v14 = vadd.f32 1e-12, %v40_v13 }
   0xc   :  { %p87_p4 = pnand %p86_p3, %p80_p0 }
   0xd   :  { %75 = vrsqrt.f32 %v41_v14 }
  0x17   :  { %v76_v15 = vpop.eup %75 }
  0x18   :  { %v44_v16 = vsel %vm43_vm0, %v76_v15, 0.0 }
  0x19   :  { %v45_v17 = vrot.slane %v44_v16, 4 }
  0x1b   :  { %v46_v18 = vadd.f32 %v45_v17, %v44_v16 }
  0x1d   :  { %v47_v19 = vrot.slane %v46_v18, 2 }
  0x1f   :  { %v48_v20 = vadd.f32 %v47_v19, %v46_v18 }
  0x21   :  { %v49_v21 = vrot.slane %v48_v20, 1 }
  0x23   :  { %v50_v22 = vadd.f32 %v49_v21, %v48_v20 }
  0x25   :  { %77 = vrcp.f32 %v50_v22 }
  0x2f   :  { %v78_v23 = vpop.eup %77 }
  0x30   :  { %v52_v24 = vmul.f32 %v78_v23, %v76_v15 }
  0x32   :  { %53 = vst.msk [vmem:[#allocation2] sm:$0xff] %vm43_vm0, %v52_v24 }
  0x33   :  { %90 = shalt.err (!%p87_p4)
}
  0x34   :  { %s91_s24 = scalar_lea.hbm %s151_s2, 128 }
  0x35   :  { %p92_p5 = scmp.ne.s32.totalorder %s151_s2, %s91_s24  ;;  %p95_p6 = scmp.lt.u32.totalorder %s91_s24, %s151_s2 }
  0x37   :  { %p97_p7 = pnand %p95_p6, %p92_p5 }
  0x39   :  { %100 = shalt.err (!%p97_p7)
}
  0x3a   :  { %63 = dma.vmem_to_hbm [thread:$0]  %s61_s1, 128, %s151_s2, [#allocation3]  }
  0x3b   :  { %101 = dma.done.wait [#allocation3], 128  }
  0x3c   :  { %102 = vsyncadd [#allocation3], 4294967168 }
  0x3d   :  { %67 = vsyncpa [#allocation3], 1 }

</bundles_post_ra>
